<compile_context>
chip_gen: v5e
topology: v5e:2x2
jax: 0.10.0
libtpu: 0.0.40
codegen_flags: <defaults>
</compile_context>

<pallas_src>
import functools
import numpy as np

import jax
import jax.numpy as jnp
from jax import lax
from jax.experimental import pallas as pl
from jax.experimental.pallas import tpu as pltpu


# Safe on v7x (64 MiB physical per TC) and well above the default scoped limit on v5e/v6e.
VMEM_LIMIT_BYTES = 48 * 1024 * 1024


def _tile(n, target):
    """Largest tile <= target that exactly divides n (avoids padded partial blocks)."""
    if n <= target:
        return n
    for c in range(target, 0, -1):
        if n % c == 0:
            return c
    return n


# ----------------------------------------------------------------------------
# Generic tiled matmul (used for the small f32 input / gamma projections)
# ----------------------------------------------------------------------------

def _matmul_kernel(a_ref, b_ref, o_ref, acc_ref):
    @pl.when(pl.program_id(2) == 0)
    def _():
        acc_ref[...] = jnp.zeros_like(acc_ref)

    acc_ref[...] += jnp.dot(a_ref[...], b_ref[...], preferred_element_type=jnp.float32)

    @pl.when(pl.program_id(2) == pl.num_programs(2) - 1)
    def _():
        o_ref[...] = acc_ref[...].astype(o_ref.dtype)


def matmul(a, b, out_dtype=None, tm=256, tn=512, tk=512):
    out_dtype = out_dtype or a.dtype
    M, K = a.shape
    _, N = b.shape
    tm, tn, tk = _tile(M, tm), _tile(N, tn), _tile(K, tk)
    return pl.pallas_call(
        _matmul_kernel,
        out_shape=jax.ShapeDtypeStruct((M, N), out_dtype),
        grid_spec=pltpu.PrefetchScalarGridSpec(
            num_scalar_prefetch=0,
            grid=(M // tm, N // tn, K // tk),
            in_specs=[pl.BlockSpec((tm, tk), lambda i, j, k: (i, k)),
                      pl.BlockSpec((tk, tn), lambda i, j, k: (k, j))],
            out_specs=pl.BlockSpec((tm, tn), lambda i, j, k: (i, j)),
            scratch_shapes=[pltpu.VMEM((tm, tn), jnp.float32)]),
        compiler_params=pltpu.CompilerParams(
            dimension_semantics=("parallel", "parallel", "arbitrary"),
            vmem_limit_bytes=VMEM_LIMIT_BYTES),
    )(a, b)


# ----------------------------------------------------------------------------
# Fused RMSNorm + matmul (QKV projection)
# ----------------------------------------------------------------------------

def _rms_matmul_kernel(x_ref, g_ref, w_ref, o_ref, *, eps):
    x = x_ref[...].astype(jnp.float32)
    ms = jnp.mean(x * x, axis=-1, keepdims=True)
    xn = (x * lax.rsqrt(ms + eps) * g_ref[...].astype(jnp.float32)).astype(w_ref.dtype)
    o_ref[...] = jnp.dot(xn, w_ref[...], preferred_element_type=jnp.float32).astype(o_ref.dtype)


def rms_matmul(x, gamma, w, eps=1e-5, out_dtype=jnp.bfloat16, tm=256, tn=512):
    M, D = x.shape
    _, N = w.shape
    tm, tn = _tile(M, tm), _tile(N, tn)
    return pl.pallas_call(
        functools.partial(_rms_matmul_kernel, eps=eps),
        out_shape=jax.ShapeDtypeStruct((M, N), out_dtype),
        grid_spec=pltpu.PrefetchScalarGridSpec(
            num_scalar_prefetch=0,
            grid=(M // tm, N // tn),
            in_specs=[pl.BlockSpec((tm, D), lambda i, j: (i, 0)),
                      pl.BlockSpec((1, D), lambda i, j: (0, 0)),
                      pl.BlockSpec((D, tn), lambda i, j: (0, j))],
            out_specs=pl.BlockSpec((tm, tn), lambda i, j: (i, j))),
        compiler_params=pltpu.CompilerParams(
            dimension_semantics=("parallel", "parallel"),
            vmem_limit_bytes=VMEM_LIMIT_BYTES),
    )(x, gamma.reshape(1, -1), w)


# ----------------------------------------------------------------------------
# Residual matmul: skip + scale * (x @ w)
# ----------------------------------------------------------------------------

def _res_matmul_kernel(x_ref, w_ref, skip_ref, o_ref, acc_ref, *, scale):
    @pl.when(pl.program_id(2) == 0)
    def _():
        acc_ref[...] = jnp.zeros_like(acc_ref)

    acc_ref[...] += jnp.dot(x_ref[...], w_ref[...], preferred_element_type=jnp.float32)

    @pl.when(pl.program_id(2) == pl.num_programs(2) - 1)
    def _():
        o_ref[...] = (skip_ref[...].astype(jnp.float32) + scale * acc_ref[...]).astype(o_ref.dtype)


def residual_matmul(x, w, skip, scale, tm=256, tn=512, tk=512):
    M, K = x.shape
    _, N = w.shape
    tm, tn, tk = _tile(M, tm), _tile(N, tn), _tile(K, tk)
    return pl.pallas_call(
        functools.partial(_res_matmul_kernel, scale=float(scale)),
        out_shape=jax.ShapeDtypeStruct((M, N), skip.dtype),
        grid_spec=pltpu.PrefetchScalarGridSpec(
            num_scalar_prefetch=0,
            grid=(M // tm, N // tn, K // tk),
            in_specs=[pl.BlockSpec((tm, tk), lambda i, j, k: (i, k)),
                      pl.BlockSpec((tk, tn), lambda i, j, k: (k, j)),
                      pl.BlockSpec((tm, tn), lambda i, j, k: (i, j))],
            out_specs=pl.BlockSpec((tm, tn), lambda i, j, k: (i, j)),
            scratch_shapes=[pltpu.VMEM((tm, tn), jnp.float32)]),
        compiler_params=pltpu.CompilerParams(
            dimension_semantics=("parallel", "parallel", "arbitrary"),
            vmem_limit_bytes=VMEM_LIMIT_BYTES),
    )(x, w, skip)


# ----------------------------------------------------------------------------
# Fused RMSNorm + MLP + residual, tiled over the 4*D hidden dimension
# ----------------------------------------------------------------------------

def _rms_mlp_kernel(x_ref, g_ref, w1_ref, w2_ref, o_ref, acc_ref, *, eps, scale):
    h = pl.program_id(1)

    @pl.when(h == 0)
    def _():
        acc_ref[...] = jnp.zeros_like(acc_ref)

    x = x_ref[...].astype(jnp.float32)
    ms = jnp.mean(x * x, axis=-1, keepdims=True)
    xn = (x * lax.rsqrt(ms + eps) * g_ref[...].astype(jnp.float32)).astype(w1_ref.dtype)
    hid = jnp.dot(xn, w1_ref[...], preferred_element_type=jnp.float32)
    hid = jax.nn.gelu(hid, approximate=True).astype(w2_ref.dtype)      # FusedMLP gelu_approx
    acc_ref[...] += jnp.dot(hid, w2_ref[...], preferred_element_type=jnp.float32)

    @pl.when(h == pl.num_programs(1) - 1)
    def _():
        # x is also the residual skip (same resident block, read again for free)
        o_ref[...] = (x_ref[...].astype(jnp.float32) + scale * acc_ref[...]).astype(o_ref.dtype)


def rms_mlp_residual(x, gamma, w1, w2, scale, eps=1e-5, tm=256, th=512):
    M, D = x.shape
    H4 = w1.shape[1]
    tm, th = _tile(M, tm), _tile(H4, th)
    return pl.pallas_call(
        functools.partial(_rms_mlp_kernel, eps=eps, scale=float(scale)),
        out_shape=jax.ShapeDtypeStruct((M, D), x.dtype),
        grid_spec=pltpu.PrefetchScalarGridSpec(
            num_scalar_prefetch=0,
            grid=(M // tm, H4 // th),
            in_specs=[pl.BlockSpec((tm, D), lambda i, h: (i, 0)),
                      pl.BlockSpec((1, D), lambda i, h: (0, 0)),
                      pl.BlockSpec((D, th), lambda i, h: (0, h)),
                      pl.BlockSpec((th, D), lambda i, h: (h, 0))],
            out_specs=pl.BlockSpec((tm, D), lambda i, h: (i, 0)),
            scratch_shapes=[pltpu.VMEM((tm, D), jnp.float32)]),
        compiler_params=pltpu.CompilerParams(
            dimension_semantics=("parallel", "arbitrary"),
            vmem_limit_bytes=VMEM_LIMIT_BYTES),
    )(x, gamma.reshape(1, -1), w1, w2)


# ----------------------------------------------------------------------------
# Output LayerNorm (affine-free norm in f32, then scale) — bf16 upcast done in-kernel
# ----------------------------------------------------------------------------

def _layernorm_kernel(x_ref, w_ref, o_ref, *, eps):
    x = x_ref[...].astype(jnp.float32)
    mu = jnp.mean(x, axis=-1, keepdims=True)
    var = jnp.mean((x - mu) ** 2, axis=-1, keepdims=True)
    o_ref[...] = ((x - mu) * lax.rsqrt(var + eps) * w_ref[...]).astype(o_ref.dtype)


def layernorm(x, w, eps=1e-5, tm=512):
    M, D = x.shape
    tm = _tile(M, tm)
    return pl.pallas_call(
        functools.partial(_layernorm_kernel, eps=eps),
        out_shape=jax.ShapeDtypeStruct((M, D), jnp.float32),
        grid_spec=pltpu.PrefetchScalarGridSpec(
            num_scalar_prefetch=0,
            grid=(M // tm,),
            in_specs=[pl.BlockSpec((tm, D), lambda i: (i, 0)),
                      pl.BlockSpec((1, D), lambda i: (0, 0))],
            out_specs=pl.BlockSpec((tm, D), lambda i: (i, 0))),
        compiler_params=pltpu.CompilerParams(
            dimension_semantics=("parallel",),
            vmem_limit_bytes=VMEM_LIMIT_BYTES),
    )(x, w.reshape(1, -1).astype(jnp.float32))


# ----------------------------------------------------------------------------
# Flash attention straight off the (B, S, 3D) qkv slab, rotary fused in-kernel.
#   grid = (batch, head, q tiles, kv tiles); output written lane-dense into (B, S, D).
# ----------------------------------------------------------------------------

def _attention_kernel(q_ref, k_ref, v_ref, cq_ref, sq_ref, ck_ref, sk_ref, rot_ref,
                      o_ref, m_sc, l_sc, acc_sc, *, scale):
    ki = pl.program_id(3)

    @pl.when(ki == 0)
    def _():
        m_sc[...] = jnp.full_like(m_sc, -jnp.inf)
        l_sc[...] = jnp.zeros_like(l_sc)
        acc_sc[...] = jnp.zeros_like(acc_sc)

    rot = rot_ref[...]

    def apply_rotary(x, cos, sin):
        # rotate_half(x) == x @ rot (rot is a +-1 permutation matrix -> MXU, no lane shuffles)
        xr = jnp.dot(x, rot, preferred_element_type=jnp.float32)
        return (x.astype(jnp.float32) * cos + xr * sin).astype(jnp.bfloat16)

    q = apply_rotary(q_ref[0], cq_ref[...], sq_ref[...])          # (tq, Dh) bf16
    k = apply_rotary(k_ref[0], ck_ref[...], sk_ref[...])          # (tk, Dh) bf16
    v = v_ref[0]                                                  # (tk, Dh) bf16

    s = lax.dot_general(q, k, (((1,), (1,)), ((), ())),
                        preferred_element_type=jnp.float32) * scale          # (tq, tk)
    m_new = jnp.maximum(m_sc[...], jnp.max(s, axis=-1, keepdims=True))
    a = jnp.exp(m_sc[...] - m_new)
    p = jnp.exp(s - m_new)
    l_sc[...] = a * l_sc[...] + jnp.sum(p, axis=-1, keepdims=True)
    acc_sc[...] = a * acc_sc[...] + jnp.dot(p.astype(v.dtype), v,
                                            preferred_element_type=jnp.float32)
    m_sc[...] = m_new

    @pl.when(ki == pl.num_programs(3) - 1)
    def _():
        o_ref[0] = (acc_sc[...] * pl.reciprocal(l_sc[...], approx=True)).astype(o_ref.dtype)


def attention(qkv, cos, sin, rot, n_heads, tq=256, tkv=512):
    """qkv: (B, S, 3*D) bf16 with last-axis layout (three, head, dh). Returns (B, S, D) bf16."""
    B, S, D3 = qkv.shape
    D = D3 // 3
    Dh = D // n_heads
    assert Dh % 128 == 0, "head_dim must be a multiple of 128 for lane-dense head slicing"
    tq, tkv = _tile(S, tq), _tile(S, tkv)
    scale = 1.0 / float(np.sqrt(Dh))

    q_spec = pl.BlockSpec((1, tq, Dh), lambda b, h, qi, ki: (b, qi, h))
    k_spec = pl.BlockSpec((1, tkv, Dh), lambda b, h, qi, ki: (b, ki, n_heads + h))
    v_spec = pl.BlockSpec((1, tkv, Dh), lambda b, h, qi, ki: (b, ki, 2 * n_heads + h))
    cq_spec = pl.BlockSpec((tq, Dh), lambda b, h, qi, ki: (qi, 0))
    ck_spec = pl.BlockSpec((tkv, Dh), lambda b, h, qi, ki: (ki, 0))
    rot_spec = pl.BlockSpec((Dh, Dh), lambda b, h, qi, ki: (0, 0))
    o_spec = pl.BlockSpec((1, tq, Dh), lambda b, h, qi, ki: (b, qi, h))

    return pl.pallas_call(
        functools.partial(_attention_kernel, scale=scale),
        out_shape=jax.ShapeDtypeStruct((B, S, D), qkv.dtype),
        grid_spec=pltpu.PrefetchScalarGridSpec(
            num_scalar_prefetch=0,
            grid=(B, n_heads, S // tq, S // tkv),
            in_specs=[q_spec, k_spec, v_spec, cq_spec, cq_spec, ck_spec, ck_spec, rot_spec],
            out_specs=o_spec,
            scratch_shapes=[pltpu.VMEM((tq, 1), jnp.float32),
                            pltpu.VMEM((tq, 1), jnp.float32),
                            pltpu.VMEM((tq, Dh), jnp.float32)]),
        compiler_params=pltpu.CompilerParams(
            dimension_semantics=("parallel", "parallel", "parallel", "arbitrary"),
            vmem_limit_bytes=VMEM_LIMIT_BYTES),
    )(qkv, qkv, qkv, cos, sin, cos, sin, rot)


# ----------------------------------------------------------------------------
# Fused readout head, tiled over the vocab axis with an online softmax:
#   logits = x_cat @ W_big + b ;  recon = softmax(logits) @ [E, E]
# ----------------------------------------------------------------------------

def _head_kernel(x_ref, w_ref, b_ref, e2_ref, logits_ref, recon_ref, m_sc, l_sc, acc_sc):
    vi = pl.program_id(1)

    @pl.when(vi == 0)
    def _():
        m_sc[...] = jnp.full_like(m_sc, -jnp.inf)
        l_sc[...] = jnp.zeros_like(l_sc)
        acc_sc[...] = jnp.zeros_like(acc_sc)

    logits = jnp.dot(x_ref[...], w_ref[...], preferred_element_type=jnp.float32) + b_ref[...]
    logits_ref[...] = logits

    m_new = jnp.maximum(m_sc[...], jnp.max(logits, axis=-1, keepdims=True))
    a = jnp.exp(m_sc[...] - m_new)
    p = jnp.exp(logits - m_new)
    l_sc[...] = a * l_sc[...] + jnp.sum(p, axis=-1, keepdims=True)
    acc_sc[...] = a * acc_sc[...] + jnp.dot(p, e2_ref[...], preferred_element_type=jnp.float32)
    m_sc[...] = m_new

    @pl.when(vi == pl.num_programs(1) - 1)
    def _():
        recon_ref[...] = acc_sc[...] * pl.reciprocal(l_sc[...], approx=True)


def output_head(x_cat, w_big, bias, e2, tm=256, tv=512):
    M, Dc = x_cat.shape
    V = w_big.shape[1]
    E2 = e2.shape[1]
    tm, tv = _tile(M, tm), _tile(V, tv)
    return pl.pallas_call(
        _head_kernel,
        out_shape=(jax.ShapeDtypeStruct((M, V), jnp.float32),
                   jax.ShapeDtypeStruct((M, E2), jnp.float32)),
        grid_spec=pltpu.PrefetchScalarGridSpec(
            num_scalar_prefetch=0,
            grid=(M // tm, V // tv),
            in_specs=[pl.BlockSpec((tm, Dc), lambda i, v: (i, 0)),
                      pl.BlockSpec((Dc, tv), lambda i, v: (0, v)),
                      pl.BlockSpec((1, tv), lambda i, v: (0, v)),
                      pl.BlockSpec((tv, E2), lambda i, v: (v, 0))],
            out_specs=(pl.BlockSpec((tm, tv), lambda i, v: (i, v)),
                       pl.BlockSpec((tm, E2), lambda i, v: (i, 0))),
            scratch_shapes=[pltpu.VMEM((tm, 1), jnp.float32),
                            pltpu.VMEM((tm, 1), jnp.float32),
                            pltpu.VMEM((tm, E2), jnp.float32)]),
        compiler_params=pltpu.CompilerParams(
            dimension_semantics=("parallel", "arbitrary"),
            vmem_limit_bytes=VMEM_LIMIT_BYTES),
    )(x_cat, w_big, bias, e2)


# ----------------------------------------------------------------------------
# Rotary tables (plain-JAX setup, computed once per sequence length)
# ----------------------------------------------------------------------------

def rotary_tables(seq_len, head_dim):
    inv_freq = 1.0 / (10000.0 ** (jnp.arange(0, head_dim, 2, dtype=jnp.float32) / head_dim))
    t = jnp.arange(seq_len, dtype=jnp.float32)
    freqs = jnp.einsum('i,j->ij', t, inv_freq)
    emb = jnp.concatenate([freqs, freqs], axis=-1)                     # (S, Dh)
    half = head_dim // 2
    rot = np.zeros((head_dim, head_dim), np.float32)                   # rotate_half as a matmul
    rot[half:, :half] = -np.eye(half, dtype=np.float32)
    rot[:half, half:] = np.eye(half, dtype=np.float32)
    return jnp.cos(emb), jnp.sin(emb), jnp.asarray(rot, jnp.bfloat16)


# ----------------------------------------------------------------------------
# Model forward
# ----------------------------------------------------------------------------

def transformer_block(x, blk, cos, sin, rot, n_heads, residual_scale):
    """x: (B, S, D) bf16. Non-causal block (TransformerBlock(causal=False))."""
    B, S, D = x.shape
    x2 = x.reshape(B * S, D)

    # attention branch: fused rmsnorm+QKV matmul, flash attention off the qkv slab
    qkv = rms_matmul(x2, blk['rms1_w'], blk['W_qkv_T'])                    # (B*S, 3D) bf16
    attn = attention(qkv.reshape(B, S, 3 * D), cos, sin, rot, n_heads)     # (B, S, D) bf16
    x2 = residual_matmul(attn.reshape(B * S, D), blk['W_attn_out_T'], x2, residual_scale)

    # MLP branch: fused rmsnorm + MLP + residual, tiled over the 4*D hidden dim
    x2 = rms_mlp_residual(x2, blk['rms2_w'], blk['W_mlp1_T'], blk['W_mlp2_T'], residual_scale)
    return x2.reshape(B, S, D)


def diffusion_model_forward(params, head, z, gamma, bias_scale, x_selfcond, selfcond_mask=None):
    """diffusion_mode='' path of DiffusionModel.forward. Returns (logits, x_reconst)."""
    B, S, E = z.shape
    D = params['dim']
    H = params['n_heads']
    V = params['vocab_size']

    if selfcond_mask is None:
        selfcond_mask = jnp.ones((B,), jnp.float32)
    m = selfcond_mask.astype(jnp.float32)[:, None, None]

    alpha_sq = jax.nn.sigmoid(-gamma)[:, None, None]
    sigma_sq = jax.nn.sigmoid(gamma)[:, None, None]
    alpha = jnp.sqrt(alpha_sq)
    z_var = alpha_sq / E + sigma_sq
    x = (z / jnp.sqrt(z_var)).astype(jnp.float32)

    # fused input + self-conditioning projection (single matmul over concatenated features)
    sc = (x_selfcond * float(np.sqrt(E))).astype(jnp.float32)
    x_in = jnp.concatenate([x, sc], axis=-1).reshape(B * S, 2 * E)
    x2 = matmul(x_in, params['W_in_cat_T'], out_dtype=jnp.float32)         # (B*S, D)

    # gamma timestep embedding
    ge = jnp.exp(jnp.linspace(-5.0, 5.0, 32))[None, :] * gamma[:, None]    # (B, 32)
    ge = jnp.concatenate([jnp.sin(ge), jnp.cos(ge)], axis=1).astype(jnp.float32)  # (B, 64)
    ge = matmul(ge, params['W_gamma_T'], out_dtype=jnp.float32)            # (B, D)
    x = x2.reshape(B, S, D) + ge[:, None, :]

    # transformer blocks (autocast bf16)
    cos, sin, rot = rotary_tables(S, D // H)
    x = x.astype(jnp.bfloat16)
    for blk in params['blocks']:
        x = transformer_block(x, blk, cos, sin, rot, H, params['residual_scale'])

    # output head
    xf = layernorm(x.reshape(B * S, D), params['out_norm_w'])
    # TODO(synk): MuReadout output_mult / width_mult() depend on mup base shapes; treated as 1.0.
    z_scaled = (bias_scale * (alpha / sigma_sq)).astype(jnp.float32) * z
    x_cat = jnp.concatenate([xf.reshape(B, S, D),
                             z_scaled * (1.0 - m),
                             z_scaled * m], axis=2)                        # (B, S, D+2E)

    logits_flat, recon2_flat = output_head(
        x_cat.reshape(B * S, D + 2 * E).astype(jnp.float32),
        head['W_big'], head['bias'], head['E2'])

    logits = logits_flat.reshape(B, S, V)
    recon2 = recon2_flat.reshape(B, S, 2 * E)
    # torch.lerp(a, b, w) = a + w*(b-a)
    x_reconst = recon2[..., :E] * (1.0 - m) + recon2[..., E:] * m
    return logits, x_reconst


# ----------------------------------------------------------------------------
# Deterministic parameter construction
# ----------------------------------------------------------------------------

def make_params(key, dim, embed_dim, n_blocks, n_heads, vocab_size):
    # NOTE: the PyTorch __init__ zero-inits selfcond/gamma/output weights; here they are
    # small random (deterministic) so every kernel path carries nonzero signal.
    ks = jax.random.split(key, 8 + 6 * n_blocks)

    def w(k, shape, scale):
        return scale * jax.random.normal(k, shape, jnp.float32)

    W_in_T = w(ks[0], (dim, embed_dim), 0.1).T              # (E, D)
    W_selfcond_T = w(ks[1], (dim, embed_dim), 0.02).T       # (E, D)

    params = {
        'dim': dim, 'n_heads': n_heads, 'vocab_size': vocab_size,
        'residual_scale': float(1.0 / np.sqrt(n_blocks)),
        # fused input/self-conditioning projection weight, precomputed once
        'W_in_cat_T': jnp.concatenate([W_in_T, W_selfcond_T], axis=0),     # (2E, D)
        'W_gamma_T': w(ks[2], (dim, 64), 0.02).T,
        'out_norm_w': jnp.ones((dim,), jnp.float32),
        'W_out_head': w(ks[3], (vocab_size, dim), 0.02),                   # MuReadout weight (V, D)
        'b_out_head': w(ks[4], (vocab_size,), 0.02),
    }
    blocks = []
    for i in range(n_blocks):
        kb = ks[8 + 6 * i: 8 + 6 * (i + 1)]
        blocks.append({
            'rms1_w': jnp.ones((dim,), jnp.float32),
            'rms2_w': jnp.ones((dim,), jnp.float32),
            'W_qkv_T': w(kb[0], (3 * dim, dim), 1.0 / np.sqrt(dim)).T.astype(jnp.bfloat16),
            'W_attn_out_T': w(kb[1], (dim, dim), 1.0 / np.sqrt(dim)).T.astype(jnp.bfloat16),
            'W_mlp1_T': w(kb[2], (4 * dim, dim), 1.0 / np.sqrt(dim)).T.astype(jnp.bfloat16),
            'W_mlp2_T': w(kb[3], (dim, 4 * dim), 1.0 / np.sqrt(4 * dim)).T.astype(jnp.bfloat16),
        })
    params['blocks'] = blocks
    return params


def make_head_params(params, embedding_matrix):
    """Precompute the fused readout weights once (not per forward call)."""
    emb = embedding_matrix.astype(jnp.float32)
    return {
        'W_big': jnp.concatenate([params['W_out_head'].T, emb.T, emb.T], axis=0),  # (D+2E, V)
        'E2': jnp.concatenate([emb, emb], axis=1),                                  # (V, 2E)
        'bias': params['b_out_head'].reshape(1, -1).astype(jnp.float32),            # (1, V)
    }


# ----------------------------------------------------------------------------
# Main
# ----------------------------------------------------------------------------

if __name__ == "__main__":
    # small shapes; head_dim = dim // n_heads = 128 so attention head blocks stay lane-dense.
    dim, embed_dim, n_blocks, n_heads, vocab_size = 256, 16, 2, 2, 32
    batch, seq = 2, 16

    key = jax.random.PRNGKey(0)
    k_par, k_z, k_g, k_sc, k_emb = jax.random.split(key, 5)

    params = make_params(k_par, dim, embed_dim, n_blocks, n_heads, vocab_size)

    z = jax.random.normal(k_z, (batch, seq, embed_dim), jnp.float32)
    gamma = jax.random.normal(k_g, (batch,), jnp.float32)
    x_selfcond = jax.random.normal(k_sc, (batch, seq, embed_dim), jnp.float32)
    embedding_matrix = 0.1 * jax.random.normal(k_emb, (vocab_size, embed_dim), jnp.float32)
    head = make_head_params(params, embedding_matrix)
    bias_scale = 1.0

    logits, x_reconst = diffusion_model_forward(
        params, head, z, gamma, bias_scale, x_selfcond)

    jax.block_until_ready((logits, x_reconst))
    assert logits.shape == (batch, seq, vocab_size)
    assert x_reconst.shape == (batch, seq, embed_dim)
    assert bool(jnp.all(jnp.isfinite(logits))) and bool(jnp.all(jnp.isfinite(x_reconst)))
    print("KERNEL_OK")
</pallas_src>

<mosaic_0001>
module attributes {stable_mosaic.version = 11 : i64} {
  func.func @_matmul_kernel(%arg0: i32, %arg1: i32, %arg2: i32, %arg3: memref<32x32xf32, #tpu.memory_space<vmem>>, %arg4: memref<32x256xf32, #tpu.memory_space<vmem>>, %arg5: memref<32x256xf32, #tpu.memory_space<vmem>>, %arg6: memref<32x256xf32, #tpu.memory_space<vmem>>) attributes {dimension_semantics = [#tpu.dimension_semantics<parallel>, #tpu.dimension_semantics<parallel>, #tpu.dimension_semantics<arbitrary>], iteration_bounds = array<i64: 1, 1, 1>, scalar_prefetch = 0 : i64, scratch_operands = 1 : i64, tpu.core_type = #tpu.core_type<tc>, window_params = [{transform_indices = @transform_0, window_bounds = array<i64: 32, 32>}, {transform_indices = @transform_1, window_bounds = array<i64: 32, 256>}, {transform_indices = @transform_2, window_bounds = array<i64: 32, 256>}]} {
    %c0_i32 = arith.constant 0 : i32
    %0 = arith.cmpi eq, %arg2, %c0_i32 : i32
    %1 = arith.extui %0 : i1 to i32
    %c0_i32_0 = arith.constant 0 : i32
    %2 = arith.cmpi ne, %1, %c0_i32_0 : i32
    scf.if %2 {
      %cst_10 = arith.constant 0.000000e+00 : f32
      %12 = vector.broadcast %cst_10 : f32 to vector<32x256xf32>
      %c0_11 = arith.constant 0 : index
      %c0_12 = arith.constant 0 : index
      %13 = vector.load %arg6[%c0_11, %c0_12] : memref<32x256xf32, #tpu.memory_space<vmem>>, vector<32x256xf32>
      tpu.vector_store %arg6[%c0_11, %c0_12], %12 {strides = array<i32>} : memref<32x256xf32, #tpu.memory_space<vmem>>, vector<32x256xf32>,
    } else {
    }
    %c0 = arith.constant 0 : index
    %c0_1 = arith.constant 0 : index
    %3 = vector.load %arg6[%c0, %c0_1] : memref<32x256xf32, #tpu.memory_space<vmem>>, vector<32x256xf32>
    %c0_2 = arith.constant 0 : index
    %c0_3 = arith.constant 0 : index
    %4 = vector.load %arg3[%c0_2, %c0_3] : memref<32x32xf32, #tpu.memory_space<vmem>>, vector<32x32xf32>
    %c0_4 = arith.constant 0 : index
    %c0_5 = arith.constant 0 : index
    %5 = vector.load %arg4[%c0_4, %c0_5] : memref<32x256xf32, #tpu.memory_space<vmem>>, vector<32x256xf32>
    %cst = arith.constant dense<0.000000e+00> : vector<32x256xf32>
    %6 = tpu.matmul %4, %5, %cst {dimension_numbers = #tpu.dot_dimension_numbers<[1], [0], [0], [1], [0, 0, 1, 1], [], []>} : vector<32x32xf32>, vector<32x256xf32>, vector<32x256xf32> -> vector<32x256xf32>
    %7 = arith.addf %3, %6 : vector<32x256xf32>
    %c0_6 = arith.constant 0 : index
    %c0_7 = arith.constant 0 : index
    %8 = vector.load %arg6[%c0_6, %c0_7] : memref<32x256xf32, #tpu.memory_space<vmem>>, vector<32x256xf32>
    tpu.vector_store %arg6[%c0_6, %c0_7], %7 {strides = array<i32>} : memref<32x256xf32, #tpu.memory_space<vmem>>, vector<32x256xf32>,
    %c0_i32_8 = arith.constant 0 : i32
    %9 = arith.cmpi eq, %arg2, %c0_i32_8 : i32
    %10 = arith.extui %9 : i1 to i32
    %c0_i32_9 = arith.constant 0 : i32
    %11 = arith.cmpi ne, %10, %c0_i32_9 : i32
    scf.if %11 {
      %c0_10 = arith.constant 0 : index
      %c0_11 = arith.constant 0 : index
      %12 = vector.load %arg6[%c0_10, %c0_11] : memref<32x256xf32, #tpu.memory_space<vmem>>, vector<32x256xf32>
      %c0_12 = arith.constant 0 : index
      %c0_13 = arith.constant 0 : index
      %13 = vector.load %arg5[%c0_12, %c0_13] : memref<32x256xf32, #tpu.memory_space<vmem>>, vector<32x256xf32>
      tpu.vector_store %arg5[%c0_12, %c0_13], %12 {strides = array<i32>} : memref<32x256xf32, #tpu.memory_space<vmem>>, vector<32x256xf32>,
    } else {
    }
    return
  }
  func.func @transform_0(%arg0: i32, %arg1: i32, %arg2: i32) -> (i32, i32) {
    %c0_i32 = arith.constant 0 : i32
    return %arg0, %arg2 : i32, i32
  }
  func.func @transform_1(%arg0: i32, %arg1: i32, %arg2: i32) -> (i32, i32) {
    %c0_i32 = arith.constant 0 : i32
    return %arg2, %arg1 : i32, i32
  }
  func.func @transform_2(%arg0: i32, %arg1: i32, %arg2: i32) -> (i32, i32) {
    %c0_i32 = arith.constant 0 : i32
    return %arg0, %arg1 : i32, i32
  }
}

</mosaic_0001>

<bundles_post_ra>
// kernel: tpu_custom_call.1
= control target key start
LH: loop header
LB: loop body
LE: loop exit
PB: predicated region body
PF: predicated region fallthrough
CT: control target
= control target key end

     0   :  { %7 = vsyncpa [#allocation4], 0  ;;  %s348_s0 = inlined_call_operand.hbm [shape: f32[32,32], index: 0, kind: input, shape index: {}]   ;;  %s349_s1 = inlined_call_operand.hbm [shape: f32[32,256], index: 1, kind: input, shape index: {}]   ;;  %s350_s2 = inlined_call_operand.hbm [shape: f32[32,256], index: 2, kind: output, shape index: {}]  }
   0x1   :  { %8 = vsyncpa [#allocation7], 0 }
   0x2   :  { %9 = vsyncpa [#allocation5], 0  ;;  %s14_s11 = sshll.u32 %s348_s0, 4  ;;  %s303_s12 = smov [#allocation3]   ;;  %s15_s11 = int_to_ptr.hbm [resolvable:$true] %s14_s11 }
   0x3   :  { %s16_s13 = sshll.u32 %s303_s12, 4  ;;  %s27_s16 = sshll.u32 %s349_s1, 4  ;;  %s17_s13 = int_to_ptr.vmem [resolvable:$true] %s16_s13  ;;  %s28_s16 = int_to_ptr.hbm [resolvable:$true] %s27_s16 }
   0x4   :  { %s304_s17 = smov 128   ;;  %s305_s18 = smov 8  }
   0x5   :  { %22 = dma.hbm_to_vmem [thread:$0]  %s15_s11, 512, %s17_s13, [#allocation4], %s304_s17, %s304_s17, %s305_s18  }
   0x6   :  { %s306_s19 = smov [#allocation6]   ;;  %s307_s21 = smov 256  }
   0x7   :  { %s29_s20 = sshll.u32 %s306_s19, 4  ;;  %s308_s22 = smov 16   ;;  %s30_s20 = int_to_ptr.vmem [resolvable:$true] %s29_s20 }
   0x8   :  { %35 = dma.hbm_to_vmem [thread:$0]  %s28_s16, 1024, %s30_s20, [#allocation7], %s307_s21, %s307_s21, %s308_s22  }
   0x9   :  { %297 = dma.done.wait [#allocation4], 512  }
   0xa   :  { %298 = vsyncadd [#allocation4], 4294966784 }
   0xb   :  { %299 = dma.done.wait [#allocation7], 1024  }
   0xc   :  { %300 = vsyncadd [#allocation7], 4294966272  ;;  %v74_v0 = vld [vmem:[#allocation6 + $0x30] sm:$0xff]  ;;  %v75_v1 = vld [vmem:[#allocation6 + $0x38] sm:$0xff]  ;;  %vm76_vm0 = vcmask 261120   ;;  %s309_s0 = smov [#allocation8]  }
   0xd   :  { %v72_v2 = vld [vmem:[#allocation6 + $0x20] sm:$0xff]  ;;  %210 = vmatpush.msra.mxu2 %v74_v0  ;;  %214 = vmatpush.msra.mxu3 %v75_v1  ;;  %v73_v3 = vld [vmem:[#allocation6 + $0x28] sm:$0xff]  ;;  %v70_v4 = vld [vmem:[#allocation6 + $0x10] sm:$0xff]  ;;  %s186_s1 = sshll.u32 %s309_s0, 4  ;;  %s188_s25 = sshll.u32 %s350_s2, 4  ;;  %s187_s1 = int_to_ptr.vmem [resolvable:$true] %s186_s1  ;;  %s189_s25 = int_to_ptr.hbm [resolvable:$true] %s188_s25 }
   0xe   :  { %v71_v5 = vld [vmem:[#allocation6 + $0x18] sm:$0xff]  ;;  %101 = vmatpush.msra.mxu0 %v74_v0  ;;  %130 = vmatpush.msra.mxu1 %v75_v1  ;;  %v68_v6 = vld [vmem:[#allocation6] sm:$0xff]  ;;  %v69_v7 = vld [vmem:[#allocation6 + $0x8] sm:$0xff] }
   0xf   :  { %211 = vmatpush.msra.mxu2 %v72_v2  ;;  %215 = vmatpush.msra.mxu3 %v73_v3  ;;  %v66_v8 = vld [vmem:[#allocation3 + $0x10] sm:$0xff]  ;;  %v64_v9 = vld [vmem:[#allocation3] sm:$0xff]  ;;  %v67_v10 = vld [vmem:[#allocation3 + $0x18] sm:$0xff] }
  0x10   :  { %102 = vmatpush.msra.mxu0 %v72_v2  ;;  %131 = vmatpush.msra.mxu1 %v73_v3  ;;  %v65_v11 = vld [vmem:[#allocation3 + $0x8] sm:$0xff] }
  0x11   :  { %212 = vmatpush.msra.mxu2 %v70_v4  ;;  %216 = vmatpush.msra.mxu3 %v71_v5 }
  0x12   :  { %103 = vmatpush.msra.mxu0 %v70_v4  ;;  %132 = vmatpush.msra.mxu1 %v71_v5 }
  0x13   :  { %213 = vmatpush.msra.mxu2 %v68_v6  ;;  %217 = vmatpush.msra.mxu3 %v69_v7 }
  0x14   :  { %204 = vmatmul.msk.f32.vlgmr.msra.gmra.mxu2 %vm76_vm0, %v66_v8  ;;  %208 = vmatmul.msk.f32.vlgmr.msra.gmra.mxu3 %vm76_vm0, %v66_v8 }
  0x15   :  { %104 = vmatpush.msra.mxu0 %v68_v6  ;;  %133 = vmatpush.msra.mxu1 %v69_v7 }
  0x16   :  { %202 = vmatmul.msk.f32.vlgmr.msra.gmra.mxu0 %vm76_vm0, %v64_v9  ;;  %206 = vmatmul.msk.f32.vlgmr.msra.gmra.mxu1 %vm76_vm0, %v64_v9 }
  0x1c   :  { %205 = vmatmul.msk.f32.gmra.mxu2 %vm76_vm0, %v67_v10  ;;  %209 = vmatmul.msk.f32.gmra.mxu3 %vm76_vm0, %v67_v10 }
  0x1e   :  { %203 = vmatmul.msk.f32.gmra.mxu0 %vm76_vm0, %v65_v11  ;;  %207 = vmatmul.msk.f32.gmra.mxu1 %vm76_vm0, %v65_v11 }
  0x93   :  { %v106_v12 = vpop.f32.mrf.mxu0  ;;  %v135_v13 = vpop.f32.mrf.mxu1 }
  0x94   :  { %174 = vst [vmem:[#allocation8] sm:$0xff] %v106_v12 }
  0x95   :  { %175 = vst [vmem:[#allocation8 + $0x8] sm:$0xff] %v135_v13 }
  0x97   :  { %v112_v14 = vpop.f32.mrf.mxu2  ;;  %v141_v15 = vpop.f32.mrf.mxu3 }
  0x98   :  { %178 = vst [vmem:[#allocation8 + $0x20] sm:$0xff] %v112_v14 }
  0x99   :  { %179 = vst [vmem:[#allocation8 + $0x28] sm:$0xff] %v141_v15 }
  0x9b   :  { %v109_v16 = vpop.f32.mrf.mxu0  ;;  %v138_v17 = vpop.f32.mrf.mxu1 }
  0x9c   :  { %176 = vst [vmem:[#allocation8 + $0x10] sm:$0xff] %v109_v16 }
  0x9d   :  { %177 = vst [vmem:[#allocation8 + $0x18] sm:$0xff] %v138_v17 }
  0x9f   :  { %v115_v18 = vpop.f32.mrf.mxu2  ;;  %v144_v19 = vpop.f32.mrf.mxu3 }
  0xa0   :  { %180 = vst [vmem:[#allocation8 + $0x30] sm:$0xff] %v115_v18 }
  0xa1   :  { %181 = vst [vmem:[#allocation8 + $0x38] sm:$0xff] %v144_v19 }
  0xa2   :  { %194 = dma.vmem_to_hbm [thread:$0]  %s187_s1, 1024, %s189_s25, [#allocation5], %s307_s21, %s307_s21, %s308_s22  }
  0xa3   :  { %301 = dma.done.wait [#allocation5], 1024  }
  0xa4   :  { %302 = vsyncadd [#allocation5], 4294966272 }
  0xa5   :  { %199 = vsyncpa [#allocation4], 1 }
  0xa6   :  { %200 = vsyncpa [#allocation7], 1 }
  0xa7   :  { %201 = vsyncpa [#allocation5], 1 }

</bundles_post_ra>
